<compile_context>
chip_gen: v7x
topology: tpu7x:2x2x1
jax: 0.10.0
libtpu: 0.0.40
codegen_flags: <defaults>
</compile_context>

<pallas_src>
import functools

import jax
import jax.numpy as jnp
from jax.experimental import pallas as pl
from jax.experimental.pallas import tpu as pltpu


# ----------------------------------------------------------------------------- kernel


def make_mlp_kernel(n_hidden, compute_dtype):
    """Fused MLP kernel: the whole layer stack runs on one batch tile in VMEM.

    Per hidden layer params: W (prev, nodes) in compute_dtype, b/s/t (1, nodes) f32,
    where s/t are the eval-mode BatchNorm scale/shift (s = gamma*rsqrt(var+eps),
    t = beta - mean*s).  Final layer: W_out as a (1, prev) row, b_out (1, 1).
    """

    def kernel(x_ref, *refs):
        out_ref = refs[-1]
        p = refs[:-1]
        h = x_ref[...].astype(compute_dtype)                # (tb, F)
        for i in range(n_hidden):
            W = p[4 * i]                                    # (prev, nodes), compute_dtype
            b = p[4 * i + 1]                                # (1, nodes), f32
            s = p[4 * i + 2]                                # (1, nodes), f32
            t = p[4 * i + 3]                                # (1, nodes), f32
            acc = jnp.dot(h, W[...], preferred_element_type=jnp.float32)
            acc = jnp.maximum(acc + b[...], 0.0)            # Linear bias + ReLU (f32)
            acc = acc * s[...] + t[...]                     # BatchNorm1d eval affine (f32)
            h = acc.astype(compute_dtype)                   # Dropout = identity in eval
        # Final Linear(prev, 1).  The output weight is stored as a (1, prev) row and
        # contracted against h's feature axis so the result is a lane-dense (1, tb)
        # slab (no (tb, 1) masked stores).
        w_row = p[4 * n_hidden]                             # (1, prev), compute_dtype
        b_out = p[4 * n_hidden + 1]                         # (1, 1), f32
        out = jax.lax.dot_general(
            w_row[...], h, (((1,), (1,)), ((), ())),
            preferred_element_type=jnp.float32) + b_out[...]
        out_ref[...] = out.astype(out_ref.dtype)            # (1, tb)

    return kernel


# ------------------------------------------------------------------- parameter handling


def init_params(key, in_features, num_nodes):
    """Shapes matching nn.Linear / nn.BatchNorm1d, with non-trivial running stats
    (as a trained model would have) so the eval-mode BN path is actually exercised."""
    params = {"hidden": []}
    prev = in_features
    for nodes in num_nodes:
        key, k1, k2, k3, k4, k5, k6 = jax.random.split(key, 7)
        bound = float(prev) ** -0.5
        params["hidden"].append({
            "W": jax.random.uniform(k1, (prev, nodes), jnp.float32, -bound, bound),
            "b": jax.random.uniform(k2, (1, nodes), jnp.float32, -bound, bound),
            "gamma": jax.random.uniform(k3, (1, nodes), jnp.float32, 0.5, 1.5),
            "beta": 0.1 * jax.random.normal(k4, (1, nodes), jnp.float32),
            "mean": 0.1 * jax.random.normal(k5, (1, nodes), jnp.float32),
            "var": jax.random.uniform(k6, (1, nodes), jnp.float32, 0.5, 1.5),
        })
        prev = nodes
    key, k1, k2 = jax.random.split(key, 3)
    bound = float(prev) ** -0.5
    params["W_out"] = jax.random.uniform(k1, (prev, 1), jnp.float32, -bound, bound)
    params["b_out"] = jax.random.uniform(k2, (1, 1), jnp.float32, -bound, bound)
    return params


def prepare_kernel_params(params, eps=1e-5, compute_dtype=jnp.bfloat16):
    """One-time host-side preprocess (eval mode only, uses running stats).

    Weights are cast to the MXU compute dtype; eval-mode BatchNorm is kept as a
    separate per-column f32 (scale, shift) applied to the f32 accumulator inside
    the kernel, so no BN scale is baked into quantised weights.
    """
    flat = []
    for L in params["hidden"]:
        s = (L["gamma"] * jax.lax.rsqrt(L["var"] + eps)).astype(jnp.float32)
        t = (L["beta"] - L["mean"] * s).astype(jnp.float32)
        flat += [L["W"].astype(compute_dtype),
                 L["b"].astype(jnp.float32), s, t]
    # Store the (prev, 1) output weight as a lane-aligned (1, prev) row.
    flat += [params["W_out"].T.astype(compute_dtype),
             params["b_out"].astype(jnp.float32)]
    return [jnp.asarray(p) for p in flat]


# ------------------------------------------------------------------------------ wrapper


def _ceil_to(n, m):
    return -(-n // m) * m


def _pick_batch_tile(B):
    """Row-tile size.

    * B <= 256: one whole-batch tile (block == full array, no alignment needed).
    * Otherwise: >= 2 tiles (so v7x's second TensorCore gets work), >= 4 tiles once
      B > 4096, each 128-aligned (keeps the lane-dense (1, tb) output block unmasked)
      and capped at 8192 rows.  At tb = 8192 / F = 16 the f32 x block is ~0.5 MiB of
      HBM bytes per grid step (amortises the ~0.35 us per-step pipeline overhead) and
      the lane-padded VMEM working set is ~20 MiB, under the 48 MiB limit below.
    """
    if B <= 256:
        return B
    target_tiles = 2 if B <= 4096 else 4
    tb = _ceil_to(-(-B // target_tiles), 128)
    return max(128, min(tb, 8192))


@functools.partial(jax.jit, static_argnames=("n_hidden", "tb"))
def _net_forward_call(x, flat_params, *, n_hidden, tb):
    B, F = x.shape
    grid = pl.cdiv(B, tb)
    compute_dtype = flat_params[0].dtype
    kernel = make_mlp_kernel(n_hidden, compute_dtype)

    in_specs = [pl.BlockSpec((tb, F), lambda i: (i, 0))]
    # Params use constant index_maps -> fetched once, stay VMEM-resident.
    in_specs += [pl.BlockSpec(p.shape, lambda i: (0, 0)) for p in flat_params]

    # Advisory cost estimate so XLA schedules the call sensibly in larger graphs.
    flops = 0
    for i in range(n_hidden):
        W = flat_params[4 * i]
        flops += 2 * B * W.shape[0] * W.shape[1]
    flops += 2 * B * flat_params[4 * n_hidden].shape[1]
    bytes_accessed = (x.size * x.dtype.itemsize
                      + sum(int(p.size) * p.dtype.itemsize for p in flat_params)
                      + B * 4)

    return pl.pallas_call(
        kernel,
        out_shape=jax.ShapeDtypeStruct((1, B), jnp.float32),   # lane-dense output slab
        grid=(grid,),
        in_specs=in_specs,
        out_specs=pl.BlockSpec((1, tb), lambda i: (0, i)),
        compiler_params=pltpu.CompilerParams(
            dimension_semantics=("parallel",),
            # Explicit scoped-VMEM budget: raises v5e's 16 MiB default, stays under
            # v7x's 64 MiB physical; the tb cap keeps estimated usage ~20 MiB.
            vmem_limit_bytes=48 * 1024 * 1024),
        cost_estimate=pl.CostEstimate(flops=flops, transcendentals=0,
                                      bytes_accessed=bytes_accessed),
    )(x, *flat_params)


def net_forward(x, flat_params, *, n_hidden, tb=None):
    """Eval-mode forward of Net.  Returns (B, 1) float32."""
    B, _ = x.shape
    if tb is None:
        tb = _pick_batch_tile(B)
    # x is streamed as-is (no cast/pad pass over the batch); the kernel casts to the
    # compute dtype in VMEM and partial final blocks are masked by Pallas.
    out_row = _net_forward_call(x, tuple(flat_params), n_hidden=n_hidden, tb=tb)
    return out_row[0, :B].reshape(B, 1).astype(jnp.float32)


# ---------------------------------------------------------------------------- reference


def ref_forward(x, params):
    """Pure-JAX reference (f32) for correctness checking."""
    h = x
    for L in params["hidden"]:
        h = h @ L["W"] + L["b"]
        h = jnp.maximum(h, 0.0)
        h = (h - L["mean"]) * jax.lax.rsqrt(L["var"] + 1e-5) * L["gamma"] + L["beta"]
    return h @ params["W_out"] + params["b_out"]


# TODO(synk): training-mode dropout (random mask + 1/(1-p) scaling) and training-mode
# BatchNorm (batch statistics + running-stat update) are not implemented; eval only.


if __name__ == "__main__":
    # Small shapes consistent with the module: batch=16 patients, 16 covariates,
    # hidden layers (32, 16), dropout=0.5 (identity in eval mode).
    B, IN_FEATURES = 16, 16
    NUM_NODES = (32, 16)

    key = jax.random.PRNGKey(0)
    key, kx = jax.random.split(key)
    x = jax.random.normal(kx, (B, IN_FEATURES), jnp.float32)

    params = init_params(key, IN_FEATURES, NUM_NODES)
    expected = ref_forward(x, params)

    # f32 path: exact check of the kernel structure (grid=1, whole-batch tile).
    flat_f32 = prepare_kernel_params(params, compute_dtype=jnp.float32)
    out_f32 = jax.block_until_ready(net_forward(x, flat_f32, n_hidden=len(NUM_NODES)))
    assert out_f32.shape == (B, 1), out_f32.shape
    assert jnp.allclose(out_f32, expected, atol=1e-4, rtol=1e-4), "f32 mismatch vs reference"

    # bf16 path (production perf config): bf16 MXU operands, f32 accumulate/epilogue.
    flat_bf16 = prepare_kernel_params(params, compute_dtype=jnp.bfloat16)
    out_bf16 = jax.block_until_ready(net_forward(x, flat_bf16, n_hidden=len(NUM_NODES)))
    assert out_bf16.shape == (B, 1), out_bf16.shape
    assert jnp.allclose(out_bf16, expected, atol=5e-2, rtol=5e-2), "bf16 mismatch vs reference"

    # Multi-tile path (grid=2, 128-aligned tiles, partial last block): exercises the
    # large-batch tiling / masked-write path on a still-small problem.
    B2 = 1000
    key, kx2 = jax.random.split(key)
    x2 = jax.random.normal(kx2, (B2, IN_FEATURES), jnp.float32)
    expected2 = ref_forward(x2, params)
    out2 = jax.block_until_ready(net_forward(x2, flat_f32, n_hidden=len(NUM_NODES)))
    assert out2.shape == (B2, 1), out2.shape
    assert jnp.allclose(out2, expected2, atol=1e-4, rtol=1e-4), "multi-tile mismatch vs reference"

    print("KERNEL_OK")
</pallas_src>

<mosaic_0001>
module attributes {stable_mosaic.version = 11 : i64} {
  func.func @kernel(%arg0: i32, %arg1: memref<16x16xf32, #tpu.memory_space<vmem>>, %arg2: memref<16x32xf32, #tpu.memory_space<vmem>>, %arg3: memref<1x32xf32, #tpu.memory_space<vmem>>, %arg4: memref<1x32xf32, #tpu.memory_space<vmem>>, %arg5: memref<1x32xf32, #tpu.memory_space<vmem>>, %arg6: memref<32x16xf32, #tpu.memory_space<vmem>>, %arg7: memref<1x16xf32, #tpu.memory_space<vmem>>, %arg8: memref<1x16xf32, #tpu.memory_space<vmem>>, %arg9: memref<1x16xf32, #tpu.memory_space<vmem>>, %arg10: memref<1x16xf32, #tpu.memory_space<vmem>>, %arg11: memref<1x1xf32, #tpu.memory_space<vmem>>, %arg12: memref<1x16xf32, #tpu.memory_space<vmem>>) attributes {dimension_semantics = [#tpu.dimension_semantics<parallel>], iteration_bounds = array<i64: 1>, scalar_prefetch = 0 : i64, scratch_operands = 0 : i64, tpu.core_type = #tpu.core_type<tc>, window_params = [{transform_indices = @transform_0, window_bounds = array<i64: 16, 16>}, {pipeline_mode = #tpu.pipeline_mode<synchronous>, transform_indices = @transform_1, window_bounds = array<i64: 16, 32>}, {pipeline_mode = #tpu.pipeline_mode<synchronous>, transform_indices = @transform_2, window_bounds = array<i64: 1, 32>}, {pipeline_mode = #tpu.pipeline_mode<synchronous>, transform_indices = @transform_3, window_bounds = array<i64: 1, 32>}, {pipeline_mode = #tpu.pipeline_mode<synchronous>, transform_indices = @transform_4, window_bounds = array<i64: 1, 32>}, {pipeline_mode = #tpu.pipeline_mode<synchronous>, transform_indices = @transform_5, window_bounds = array<i64: 32, 16>}, {pipeline_mode = #tpu.pipeline_mode<synchronous>, transform_indices = @transform_6, window_bounds = array<i64: 1, 16>}, {pipeline_mode = #tpu.pipeline_mode<synchronous>, transform_indices = @transform_7, window_bounds = array<i64: 1, 16>}, {pipeline_mode = #tpu.pipeline_mode<synchronous>, transform_indices = @transform_8, window_bounds = array<i64: 1, 16>}, {pipeline_mode = #tpu.pipeline_mode<synchronous>, transform_indices = @transform_9, window_bounds = array<i64: 1, 16>}, {pipeline_mode = #tpu.pipeline_mode<synchronous>, transform_indices = @transform_10, window_bounds = array<i64: 1, 1>}, {transform_indices = @transform_11, window_bounds = array<i64: 1, 16>}]} {
    %c0 = arith.constant 0 : index
    %c0_0 = arith.constant 0 : index
    %0 = vector.load %arg1[%c0, %c0_0] : memref<16x16xf32, #tpu.memory_space<vmem>>, vector<16x16xf32>
    %c0_1 = arith.constant 0 : index
    %c0_2 = arith.constant 0 : index
    %1 = vector.load %arg2[%c0_1, %c0_2] : memref<16x32xf32, #tpu.memory_space<vmem>>, vector<16x32xf32>
    %cst = arith.constant dense<0.000000e+00> : vector<16x32xf32>
    %2 = tpu.matmul %0, %1, %cst {dimension_numbers = #tpu.dot_dimension_numbers<[1], [0], [0], [1], [0, 0, 1, 1], [], []>} : vector<16x16xf32>, vector<16x32xf32>, vector<16x32xf32> -> vector<16x32xf32>
    %c0_3 = arith.constant 0 : index
    %c0_4 = arith.constant 0 : index
    %3 = vector.load %arg3[%c0_3, %c0_4] : memref<1x32xf32, #tpu.memory_space<vmem>>, vector<1x32xf32>
    %4 = vector.broadcast %3 : vector<1x32xf32> to vector<16x32xf32>
    %5 = arith.addf %2, %4 : vector<16x32xf32>
    %cst_5 = arith.constant 0.000000e+00 : f32
    %6 = vector.broadcast %cst_5 : f32 to vector<16x32xf32>
    %7 = arith.maximumf %5, %6 : vector<16x32xf32>
    %c0_6 = arith.constant 0 : index
    %c0_7 = arith.constant 0 : index
    %8 = vector.load %arg4[%c0_6, %c0_7] : memref<1x32xf32, #tpu.memory_space<vmem>>, vector<1x32xf32>
    %9 = vector.broadcast %8 : vector<1x32xf32> to vector<16x32xf32>
    %10 = arith.mulf %7, %9 : vector<16x32xf32>
    %c0_8 = arith.constant 0 : index
    %c0_9 = arith.constant 0 : index
    %11 = vector.load %arg5[%c0_8, %c0_9] : memref<1x32xf32, #tpu.memory_space<vmem>>, vector<1x32xf32>
    %12 = vector.broadcast %11 : vector<1x32xf32> to vector<16x32xf32>
    %13 = arith.addf %10, %12 : vector<16x32xf32>
    %c0_10 = arith.constant 0 : index
    %c0_11 = arith.constant 0 : index
    %14 = vector.load %arg6[%c0_10, %c0_11] : memref<32x16xf32, #tpu.memory_space<vmem>>, vector<32x16xf32>
    %cst_12 = arith.constant dense<0.000000e+00> : vector<16x16xf32>
    %15 = tpu.matmul %13, %14, %cst_12 {dimension_numbers = #tpu.dot_dimension_numbers<[1], [0], [0], [1], [0, 0, 1, 1], [], []>} : vector<16x32xf32>, vector<32x16xf32>, vector<16x16xf32> -> vector<16x16xf32>
    %c0_13 = arith.constant 0 : index
    %c0_14 = arith.constant 0 : index
    %16 = vector.load %arg7[%c0_13, %c0_14] : memref<1x16xf32, #tpu.memory_space<vmem>>, vector<1x16xf32>
    %17 = vector.broadcast %16 : vector<1x16xf32> to vector<16x16xf32>
    %18 = arith.addf %15, %17 : vector<16x16xf32>
    %cst_15 = arith.constant 0.000000e+00 : f32
    %19 = vector.broadcast %cst_15 : f32 to vector<16x16xf32>
    %20 = arith.maximumf %18, %19 : vector<16x16xf32>
    %c0_16 = arith.constant 0 : index
    %c0_17 = arith.constant 0 : index
    %21 = vector.load %arg8[%c0_16, %c0_17] : memref<1x16xf32, #tpu.memory_space<vmem>>, vector<1x16xf32>
    %22 = vector.broadcast %21 : vector<1x16xf32> to vector<16x16xf32>
    %23 = arith.mulf %20, %22 : vector<16x16xf32>
    %c0_18 = arith.constant 0 : index
    %c0_19 = arith.constant 0 : index
    %24 = vector.load %arg9[%c0_18, %c0_19] : memref<1x16xf32, #tpu.memory_space<vmem>>, vector<1x16xf32>
    %25 = vector.broadcast %24 : vector<1x16xf32> to vector<16x16xf32>
    %26 = arith.addf %23, %25 : vector<16x16xf32>
    %c0_20 = arith.constant 0 : index
    %c0_21 = arith.constant 0 : index
    %27 = vector.load %arg10[%c0_20, %c0_21] : memref<1x16xf32, #tpu.memory_space<vmem>>, vector<1x16xf32>
    %cst_22 = arith.constant dense<0.000000e+00> : vector<1x16xf32>
    %28 = tpu.matmul %27, %26, %cst_22 {dimension_numbers = #tpu.dot_dimension_numbers<[1], [1], [0], [0], [0, 0, 1, 0], [], []>} : vector<1x16xf32>, vector<16x16xf32>, vector<1x16xf32> -> vector<1x16xf32>
    %c0_23 = arith.constant 0 : index
    %c0_24 = arith.constant 0 : index
    %29 = vector.load %arg11[%c0_23, %c0_24] : memref<1x1xf32, #tpu.memory_space<vmem>>, vector<1x1xf32>
    %30 = vector.broadcast %29 : vector<1x1xf32> to vector<1x16xf32>
    %31 = arith.addf %28, %30 : vector<1x16xf32>
    %c0_25 = arith.constant 0 : index
    %c0_26 = arith.constant 0 : index
    %32 = vector.load %arg12[%c0_25, %c0_26] : memref<1x16xf32, #tpu.memory_space<vmem>>, vector<1x16xf32>
    tpu.vector_store %arg12[%c0_25, %c0_26], %31 {strides = array<i32>} : memref<1x16xf32, #tpu.memory_space<vmem>>, vector<1x16xf32>,
    return
  }
  func.func @transform_0(%arg0: i32) -> (i32, i32) {
    %c0_i32 = arith.constant 0 : i32
    %c0_i32_0 = arith.constant 0 : i32
    return %arg0, %c0_i32 : i32, i32
  }
  func.func @transform_1(%arg0: i32) -> (i32, i32) {
    %c0_i32 = arith.constant 0 : i32
    %c0_i32_0 = arith.constant 0 : i32
    %c0_i32_1 = arith.constant 0 : i32
    return %c0_i32, %c0_i32_0 : i32, i32
  }
  func.func @transform_2(%arg0: i32) -> (i32, i32) {
    %c0_i32 = arith.constant 0 : i32
    %c0_i32_0 = arith.constant 0 : i32
    %c0_i32_1 = arith.constant 0 : i32
    return %c0_i32, %c0_i32_0 : i32, i32
  }
  func.func @transform_3(%arg0: i32) -> (i32, i32) {
    %c0_i32 = arith.constant 0 : i32
    %c0_i32_0 = arith.constant 0 : i32
    %c0_i32_1 = arith.constant 0 : i32
    return %c0_i32, %c0_i32_0 : i32, i32
  }
  func.func @transform_4(%arg0: i32) -> (i32, i32) {
    %c0_i32 = arith.constant 0 : i32
    %c0_i32_0 = arith.constant 0 : i32
    %c0_i32_1 = arith.constant 0 : i32
    return %c0_i32, %c0_i32_0 : i32, i32
  }
  func.func @transform_5(%arg0: i32) -> (i32, i32) {
    %c0_i32 = arith.constant 0 : i32
    %c0_i32_0 = arith.constant 0 : i32
    %c0_i32_1 = arith.constant 0 : i32
    return %c0_i32, %c0_i32_0 : i32, i32
  }
  func.func @transform_6(%arg0: i32) -> (i32, i32) {
    %c0_i32 = arith.constant 0 : i32
    %c0_i32_0 = arith.constant 0 : i32
    %c0_i32_1 = arith.constant 0 : i32
    return %c0_i32, %c0_i32_0 : i32, i32
  }
  func.func @transform_7(%arg0: i32) -> (i32, i32) {
    %c0_i32 = arith.constant 0 : i32
    %c0_i32_0 = arith.constant 0 : i32
    %c0_i32_1 = arith.constant 0 : i32
    return %c0_i32, %c0_i32_0 : i32, i32
  }
  func.func @transform_8(%arg0: i32) -> (i32, i32) {
    %c0_i32 = arith.constant 0 : i32
    %c0_i32_0 = arith.constant 0 : i32
    %c0_i32_1 = arith.constant 0 : i32
    return %c0_i32, %c0_i32_0 : i32, i32
  }
  func.func @transform_9(%arg0: i32) -> (i32, i32) {
    %c0_i32 = arith.constant 0 : i32
    %c0_i32_0 = arith.constant 0 : i32
    %c0_i32_1 = arith.constant 0 : i32
    return %c0_i32, %c0_i32_0 : i32, i32
  }
  func.func @transform_10(%arg0: i32) -> (i32, i32) {
    %c0_i32 = arith.constant 0 : i32
    %c0_i32_0 = arith.constant 0 : i32
    %c0_i32_1 = arith.constant 0 : i32
    return %c0_i32, %c0_i32_0 : i32, i32
  }
  func.func @transform_11(%arg0: i32) -> (i32, i32) {
    %c0_i32 = arith.constant 0 : i32
    %c0_i32_0 = arith.constant 0 : i32
    return %c0_i32, %arg0 : i32, i32
  }
}

</mosaic_0001>

<bundles_post_ra>
// kernel: _net_forward_call.1
= control target key start
LH: loop header
LB: loop body
LE: loop exit
PB: predicated region body
PF: predicated region fallthrough
CT: control target
= control target key end

     0   :  { %s600_s0 = inlined_call_operand.vmem [shape: f32[16,16], index: 0, kind: input, shape index: {}]   ;;  %s601_s1 = inlined_call_operand.vmem [shape: f32[16,32], index: 1, kind: input, shape index: {}]   ;;  %s602_s2 = inlined_call_operand.vmem [shape: f32[1,32], index: 2, kind: input, shape index: {}]   ;;  %s603_s3 = inlined_call_operand.vmem [shape: f32[1,32], index: 3, kind: input, shape index: {}]   ;;  %s604_s4 = inlined_call_operand.vmem [shape: f32[1,32], index: 4, kind: input, shape index: {}]   ;;  %s605_s5 = inlined_call_operand.vmem [shape: f32[32,16], index: 5, kind: input, shape index: {}]   ;;  %s606_s6 = inlined_call_operand.vmem [shape: f32[1,16], index: 6, kind: input, shape index: {}]   ;;  %s607_s7 = inlined_call_operand.vmem [shape: f32[1,16], index: 7, kind: input, shape index: {}]   ;;  %s608_s8 = inlined_call_operand.vmem [shape: f32[1,16], index: 8, kind: input, shape index: {}]   ;;  %s609_s9 = inlined_call_operand.vmem [shape: f32[1,16], index: 9, kind: input, shape index: {}]   ;;  %s610_s10 = inlined_call_operand.<no memory space> [shape: f32[1,1], index: 10, kind: input, shape index: {}]   ;;  %s611_s11 = inlined_call_operand.hbm [shape: f32[1,16], index: 11, kind: output, shape index: {}]  }
   0x1   :  { %v16_v0 = vstv %s610_s10 }
   0x2   :  { %17 = vst [vmem:[#allocation2] sm:$0x1] %v16_v0 }
   0x3   :  { %v43_v1 = vld [vmem:[%s601_s1] sm:$0xff]  ;;  %v44_v2 = vld [vmem:[%s601_s1 + $0x8] sm:$0xff]  ;;  %vm52_vm0 = vcmask 130048  }
   0x4   :  { %v41_v3 = vld [vmem:[%s600_s0] sm:$0xff]  ;;  %v424_v4 = vpack.c.bf16 %v44_v2, %v43_v1 }
   0x5   :  { %403 = vmatprep.mubr.msk.f32.mxu0 %vm52_vm0, %v41_v3 }
   0x6   :  { %18 = vsyncpa [#allocation4], 0  ;;  %425 = vmatprep.subr.bf16.mxu0 %v424_v4  ;;  %v42_v5 = vld [vmem:[%s600_s0 + $0x8] sm:$0xff]  ;;  %v154_v6 = vld [vmem:[%s605_s5] sm:$0xff]  ;;  %vm165_vm1 = vcmask 261120   ;;  %v470_v25 = vmov 0.0|0.0   ;;  %v274_v44 = vlaneseq }
   0x7   :  { %427 = vmatpush3.bf16.msra.mxu0 %v424_v4  ;;  %v155_v7 = vld [vmem:[%s605_s5 + $0x8] sm:$0xff]  ;;  %v156_v9 = vld [vmem:[%s605_s5 + $0x10] sm:$0xff]  ;;  %v157_v10 = vld [vmem:[%s605_s5 + $0x18] sm:$0xff]  ;;  %vm471_vm2 = vmmov 0   ;;  %v472_v26 = vmov 0.0   ;;  %v473_v28 = vmov 0  }
   0x8   :  { %v428_v8 = vpack.c.bf16 %v155_v7, %v154_v6  ;;  %v432_v11 = vpack.c.bf16 %v157_v10, %v156_v9  ;;  %v373_v12 = vld [vmem:[%s602_s2] ss:$0 sm:$0xff]  ;;  %436 = vmatprep.subr.bf16.mxu0 %v470_v25  ;;  %445 = vset.pattern.permute.xlu0 %v473_v28  ;;  %vm438_vm3 = vmpackc.low %vm52_vm0, %vm52_vm0  ;;  %v275_v45 = vshrl.u32 %v274_v44, 7  ;;  %vm357_vm4 = vcmask 122880  }
   0x9   :  { %v376_v16 = vld [vmem:[%s603_s3] ss:$0 sm:$0xff] }
   0xa   :  { %404 = vmatmul.mubr.msk.f32.vlgmr.msra.gmra.mrb[0].mxu0 %vm52_vm0, %v42_v5  ;;  %429 = vmatprep.subr.bf16.mxu1 %v428_v8  ;;  %v377_v21 = vld [vmem:[%s604_s4] ss:$0 sm:$0xff]  ;;  %v276_v46 = vsub.s32 0, %v275_v45 }
   0xb   :  { %431 = vmatpush3.bf16.msra.mxu1 %v428_v8  ;;  %421 = vmatprep.mubr.msk.f32.mxu0 %vm471_vm2, %v472_v26  ;;  %v268_v27 = vld [vmem:[#allocation2] sm:$0x1] }
   0xc   :  { %433 = vmatprep.subr.bf16.mxu1 %v432_v11  ;;  %271 = vperm.xlu0 %445, %v268_v27   ;;  %v378_v29 = vld [vmem:[%s606_s6] ss:$0 sm:$0xff] }
   0xd   :  { %v381_v33 = vld [vmem:[%s607_s7] ss:$0 sm:$0xff]  ;;  %s474_s7 = smov [#allocation3]  }
   0xe   :  { %v382_v36 = vld [vmem:[%s608_s8] ss:$0 sm:$0xff]  ;;  %s365_s8 = sshll.u32 %s474_s7, 4  ;;  %s366_s8 = int_to_ptr.vmem [resolvable:$true] %s365_s8 }
   0xf   :  { %435 = vmatpush3.bf16.msra.mxu1 %v432_v11  ;;  %v267_v43 = vld [vmem:[%s609_s9] sm:$0x1]  ;;  %s446_s22 = scalar_lea.vmem %s366_s8, 16  ;;  %s450_s23 = scalar_lea.vmem %s366_s8, 32 }
  0x10   :  { %p447_p0 = scmp.ne.s32.totalorder %s366_s8, %s446_s22  ;;  %p451_p1 = scmp.lt.s32.totalorder %s366_s8, %s366_s8 }
  0x11   :  { %p452_p2 = scmp.lt.s32.totalorder %s450_s23, %s446_s22 }
  0x13   :  { %p453_p3 = por %p452_p2, %p451_p1 }
  0x15   :  { %p454_p4 = pnand %p453_p3, %p447_p0 }
  0x8b   :  { %v272_v47 = vpop.permute.xlu0 %271 }
  0x8c   :  { %v277_v48 = vrot.slane %v272_v47, %v276_v46 }
  0xdd   :  { %v405_v13 = vpop.f32.mrb[0].mxu0 }
  0xde   :  { %v131_v14 = vadd.f32 %v405_v13, %v373_v12  ;;  %v125_v15 = vpop.f32.mrb[1].mxu0 }
  0xdf   :  { %v126_v17 = vadd.f32 %v373_v12, %v125_v15 }
  0xe0   :  { %v135_v18 = vmax.f32 %v131_v14, 0.0 }
  0xe1   :  { %v134_v19 = vmax.f32 %v126_v17, 0.0 }
  0xe2   :  { %v144_v20 = vmul.f32 %v376_v16, %v135_v18 }
  0xe3   :  { %v143_v22 = vmul.f32 %v376_v16, %v134_v19 }
  0xe4   :  { %v153_v24 = vadd.f32 %v377_v21, %v144_v20 }
  0xe5   :  { %v152_v23 = vadd.f32 %v377_v21, %v143_v22 }
  0xe7   :  { %414 = vmatprep.mubr.msk.f32.mxu1 %vm165_vm1, %v152_v23 }
  0xe8   :  { %415 = vmatmul.mubr.msk.f32.vlgmr.msra.gmra.mrb[0].mxu1 %vm165_vm1, %v153_v24 }
 0x1bb   :  { %v416_v30 = vpop.f32.mrb[0].mxu1 }
 0x1bc   :  { %v244_v31 = vadd.f32 %v416_v30, %v378_v29  ;;  %v238_v32 = vpop.f32.mrb[1].mxu1 }
 0x1bd   :  { %v239_v34 = vadd.f32 %v378_v29, %v238_v32 }
 0x1be   :  { %v248_v35 = vmax.f32 %v244_v31, 0.0 }
 0x1bf   :  { %v247_v37 = vmax.f32 %v239_v34, 0.0 }
 0x1c0   :  { %v257_v38 = vmul.f32 %v381_v33, %v248_v35 }
 0x1c1   :  { %v256_v39 = vmul.f32 %v381_v33, %v247_v37 }
 0x1c2   :  { %v266_v40 = vadd.f32 %v382_v36, %v257_v38 }
 0x1c3   :  { %v265_v41 = vadd.f32 %v382_v36, %v256_v39 }
 0x1c5   :  { %v437_v42 = vpack.c.bf16 %v266_v40, %v265_v41 }
 0x1c7   :  { %439 = vmatpush3.bf16.xpose.msk.msra.mxu0 %vm438_vm3, %v437_v42 }
 0x1ce   :  { %422 = vmatmul.mubr.msk.f32.vlgmr.msra.gmra.mrb[2].mxu0 %vm52_vm0, %v267_v43 }
 0x2a1   :  { %v353_v49 = vpop.f32.mrb[2].mxu0 }
 0x2a2   :  { %v354_v50 = vadd.f32 %v353_v49, %v277_v48  ;;  %v423_v51 = vpop.f32.mrb[3].mxu0 }
 0x2a4   :  { %358 = vst.msk [vmem:[#allocation3] sm:$0x1] %vm357_vm4, %v354_v50 }
 0x2a5   :  { %457 = shalt.err (!%p454_p4)
}
 0x2a6   :  { %s458_s10 = scalar_lea.hbm %s611_s11, 16 }
 0x2a7   :  { %p459_p5 = scmp.ne.s32.totalorder %s611_s11, %s458_s10  ;;  %p462_p6 = scmp.lt.u32.totalorder %s458_s10, %s611_s11 }
 0x2a9   :  { %p464_p7 = pnand %p462_p6, %p459_p5 }
 0x2ab   :  { %467 = shalt.err (!%p464_p7)
}
 0x2ac   :  { %368 = dma.vmem_to_hbm [thread:$0]  %s366_s8, 16, %s611_s11, [#allocation4]  }
 0x2ad   :  { %468 = dma.done.wait [#allocation4], 16  }
 0x2ae   :  { %469 = vsyncadd [#allocation4], 4294967280 }
 0x2af   :  { %372 = vsyncpa [#allocation4], 1 }

</bundles_post_ra>
